<compile_context>
chip_gen: v5e
topology: v5e:2x2
jax: 0.10.0
libtpu: 0.0.40
codegen_flags: <defaults>
</compile_context>

<pallas_src>
import functools

import jax
import jax.numpy as jnp
from jax import lax
from jax.experimental import pallas as pl
from jax.experimental.pallas import tpu as pltpu


def _round_up(x: int, m: int) -> int:
    return (x + m - 1) // m * m


def _sublane(dtype) -> int:
    # Packed-row granularity: f32 -> 8, bf16/f16 -> 16, int8/fp8 -> 32.
    return {4: 8, 2: 16, 1: 32}[jnp.dtype(dtype).itemsize]


def _linear_block_kernel(x_ref, w_ref, b_ref, o_ref, acc_ref, *,
                         activation: str, mask_k: bool, c_in: int, tk: int):
    # x_ref: (tm, tk), w_ref: (tk, tn) [pre-transposed weight], b_ref: (1, tn) f32
    k = pl.program_id(2)

    @pl.when(k == 0)
    def _():
        acc_ref[...] = jnp.zeros_like(acc_ref)

    x = x_ref[...]
    w = w_ref[...]
    if mask_k:
        # Only the last K block can run past C_in; zero BOTH operands in the
        # OOB region so garbage (possibly NaN/Inf) cannot contaminate the sum.
        kcol = k * tk + lax.broadcasted_iota(jnp.int32, x.shape, 1)   # (tm, tk)
        x = jnp.where(kcol < c_in, x, jnp.zeros_like(x))
        krow = k * tk + lax.broadcasted_iota(jnp.int32, w.shape, 0)   # (tk, tn)
        w = jnp.where(krow < c_in, w, jnp.zeros_like(w))

    # MXU matmul in the streamed dtype, f32 accumulation.
    acc_ref[...] += jnp.dot(x, w, preferred_element_type=jnp.float32)

    @pl.when(k == pl.num_programs(2) - 1)
    def _():
        y = acc_ref[...] + b_ref[...]          # f32 epilogue
        if activation == "relu":
            y = jnp.maximum(y, 0.0)            # VPU
        else:  # "tanh" (validated in wrapper)
            y = jnp.tanh(y)                    # EUP slot, hides under MXU/VPU
        o_ref[...] = y.astype(o_ref.dtype)


def linear_block(x, weight, bias, *, activation: str = "relu",
                 mxu_dtype=None,
                 tm_max: int = 512, tn_max: int = 512, tk_max: int = 1024,
                 vmem_budget_bytes: int = 24 * 1024 * 1024):
    """Forward of LinearBlock (eval mode): act(x @ weight.T + bias).

    Args:
      x:         (B, C_in)
      weight:    (C_out, C_in)  (PyTorch nn.Linear layout)
      bias:      (C_out,)
      mxu_dtype: optional dtype (e.g. jnp.bfloat16) used to stream/feed the
                 MXU; accumulation and epilogue stay f32. None = native dtype.
    Returns:
      (B, C_out) in x.dtype.
    """
    if activation not in ("relu", "tanh"):
        raise ValueError(f"Unsupported activation function: {activation}")

    B, C_in = x.shape
    C_out, C_in_w = weight.shape
    assert C_in == C_in_w, (C_in, C_in_w)
    assert bias.shape == (C_out,)

    out_dtype = x.dtype
    compute_dtype = jnp.dtype(mxu_dtype) if mxu_dtype is not None else jnp.dtype(x.dtype)

    # One-time canonical-layout copy: (C_in, C_out) so every grid step is a
    # plain (tm,tk)x(tk,tn) MXU dot (no per-step XLU transpose of the weight
    # tile). Transpose + cast fuse into a single XLA pass; hoist/cache for
    # repeated inference.
    xc = x.astype(compute_dtype) if compute_dtype != jnp.dtype(x.dtype) else x
    w_t = weight.T.astype(compute_dtype)
    b2 = bias.reshape(1, C_out).astype(jnp.float32)

    in_item = compute_dtype.itemsize
    out_item = jnp.dtype(out_dtype).itemsize
    sub = _sublane(compute_dtype)

    # Tile sizes: sublane-aligned M, lane-dense (multiple-of-128) N/K, as big
    # as the problem / caps allow.
    tm = min(_round_up(B, sub), _round_up(tm_max, sub))
    tn = min(_round_up(C_out, 128), _round_up(tn_max, 128))
    tk = min(_round_up(C_in, 128), _round_up(tk_max, 128))

    def working_set(tm_, tn_, tk_):
        # double-buffered x / w / out / bias tiles + resident f32 accumulator
        return (2 * (tm_ * tk_ * in_item + tk_ * tn_ * in_item
                     + tm_ * tn_ * out_item + tn_ * 4)
                + tm_ * tn_ * 4)

    # Keep the double-buffered working set within budget (v7x: 64 MiB VMEM/TC).
    while working_set(tm, tn, tk) > vmem_budget_bytes and tk > 128:
        tk = _round_up(tk // 2, 128)
    while working_set(tm, tn, tk) > vmem_budget_bytes and tn > 128:
        tn = _round_up(tn // 2, 128)
    while working_set(tm, tn, tk) > vmem_budget_bytes and tm > sub:
        tm = _round_up(tm // 2, sub)

    grid_m = pl.cdiv(B, tm)
    grid_n = pl.cdiv(C_out, tn)
    grid_k = pl.cdiv(C_in, tk)

    # Give v7x's two TensorCores work: make sure at least one "parallel" axis
    # has >= 2 tiles when the shape allows it.
    if grid_m == 1 and grid_n == 1 and tn > 128:
        tn = _round_up(tn // 2, 128)
        grid_n = pl.cdiv(C_out, tn)

    grid = (grid_m, grid_n, grid_k)
    mask_k = (C_in % tk) != 0

    # Explicit scoped-VMEM limit so v5e's 16 MiB default doesn't block the
    # larger tiling; stays well under v7x's 64 MiB physical VMEM per core.
    vmem_limit = int(min(max(working_set(tm, tn, tk) * 3 // 2 + (2 << 20),
                             16 << 20), 48 << 20))

    cost = pl.CostEstimate(
        flops=2 * (grid_m * tm) * (grid_n * tn) * (grid_k * tk),
        transcendentals=((grid_m * tm) * (grid_n * tn)
                         if activation == "tanh" else 0),
        bytes_accessed=(B * C_in * in_item * grid_n        # x re-read per N tile
                        + C_in * C_out * in_item * grid_m  # w re-read per M tile
                        + C_out * 4 * grid_m               # bias
                        + B * C_out * out_item),           # output written once
    )

    kernel = functools.partial(_linear_block_kernel, activation=activation,
                               mask_k=mask_k, c_in=C_in, tk=tk)

    return pl.pallas_call(
        kernel,
        out_shape=jax.ShapeDtypeStruct((B, C_out), out_dtype),
        grid_spec=pltpu.PrefetchScalarGridSpec(
            num_scalar_prefetch=0,
            grid=grid,
            in_specs=[
                pl.BlockSpec((tm, tk), lambda i, j, k: (i, k)),   # x tile
                pl.BlockSpec((tk, tn), lambda i, j, k: (k, j)),   # weight.T tile
                pl.BlockSpec((1, tn), lambda i, j, k: (0, j)),    # bias tile
            ],
            out_specs=pl.BlockSpec((tm, tn), lambda i, j, k: (i, j)),
            scratch_shapes=[pltpu.VMEM((tm, tn), jnp.float32)],
        ),
        compiler_params=pltpu.CompilerParams(
            dimension_semantics=("parallel", "parallel", "arbitrary"),
            vmem_limit_bytes=vmem_limit,
        ),
        cost_estimate=cost,
    )(xc, w_t, b2)


def init_linear_params(key, in_channels, out_channels):
    """Deterministic init matching nn.Linear's default (uniform +/- 1/sqrt(fan_in))."""
    k_w, k_b = jax.random.split(key)
    bound = 1.0 / (in_channels ** 0.5)
    weight = jax.random.uniform(
        k_w, (out_channels, in_channels), jnp.float32, -bound, bound)
    bias = jax.random.uniform(k_b, (out_channels,), jnp.float32, -bound, bound)
    return weight, bias


def _reference(x, weight, bias, activation):
    y = x @ weight.T + bias
    return jnp.maximum(y, 0.0) if activation == "relu" else jnp.tanh(y)


if __name__ == "__main__":
    key = jax.random.PRNGKey(0)
    k1, k2, k3, k4, k5, k6 = jax.random.split(key, 6)

    # ---- 1) Demo shapes from the module: batch=8, in=32, out=32 (ReLU) -----
    B, C_in, C_out = 8, 32, 32
    x = jax.random.normal(k1, (B, C_in), jnp.float32)
    weight, bias = init_linear_params(k2, C_in, C_out)
    out = jax.block_until_ready(linear_block(x, weight, bias, activation="relu"))
    ref = _reference(x, weight, bias, "relu")
    assert out.shape == (B, C_out)
    assert jnp.allclose(out, ref, atol=2e-5, rtol=2e-5)

    # ---- 2) MNIST-like 784 -> 128, tanh: multi-step K grid + last-K mask ---
    B2, C_in2, C_out2 = 16, 784, 128
    x2 = jax.random.normal(k3, (B2, C_in2), jnp.float32)
    weight2, bias2 = init_linear_params(k4, C_in2, C_out2)
    out2 = jax.block_until_ready(
        linear_block(x2, weight2, bias2, activation="tanh", tk_max=256))
    ref2 = _reference(x2, weight2, bias2, "tanh")
    assert out2.shape == (B2, C_out2)
    assert jnp.allclose(out2, ref2, atol=1e-4, rtol=1e-4)

    # ---- 3) bf16 MXU feed (perf path), aligned shapes, N split for 2 TCs ---
    B3, C_in3, C_out3 = 64, 256, 256
    x3 = jax.random.normal(k5, (B3, C_in3), jnp.float32)
    weight3, bias3 = init_linear_params(k6, C_in3, C_out3)
    out3 = jax.block_until_ready(
        linear_block(x3, weight3, bias3, activation="tanh",
                     mxu_dtype=jnp.bfloat16))
    x3b = x3.astype(jnp.bfloat16).astype(jnp.float32)
    w3b = weight3.astype(jnp.bfloat16).astype(jnp.float32)
    ref3 = jnp.tanh(x3b @ w3b.T + bias3)
    assert out3.shape == (B3, C_out3)
    assert jnp.allclose(out3, ref3, atol=5e-3, rtol=5e-3)

    print("KERNEL_OK")
</pallas_src>

<mosaic_0001>
module attributes {stable_mosaic.version = 11 : i64} {
  func.func @_linear_block_kernel(%arg0: i32, %arg1: i32, %arg2: i32, %arg3: memref<8x128xf32, #tpu.memory_space<vmem>>, %arg4: memref<128x128xf32, #tpu.memory_space<vmem>>, %arg5: memref<1x128xf32, #tpu.memory_space<vmem>>, %arg6: memref<8x128xf32, #tpu.memory_space<vmem>>, %arg7: memref<8x128xf32, #tpu.memory_space<vmem>>) attributes {dimension_semantics = [#tpu.dimension_semantics<parallel>, #tpu.dimension_semantics<parallel>, #tpu.dimension_semantics<arbitrary>], iteration_bounds = array<i64: 1, 1, 1>, scalar_prefetch = 0 : i64, scratch_operands = 1 : i64, tpu.core_type = #tpu.core_type<tc>, window_params = [{transform_indices = @transform_0, window_bounds = array<i64: 8, 128>}, {transform_indices = @transform_1, window_bounds = array<i64: 128, 128>}, {transform_indices = @transform_2, window_bounds = array<i64: 1, 128>}, {transform_indices = @transform_3, window_bounds = array<i64: 8, 128>}]} {
    %c0_i32 = arith.constant 0 : i32
    %0 = arith.cmpi eq, %arg2, %c0_i32 : i32
    %1 = arith.extui %0 : i1 to i32
    %c0_i32_0 = arith.constant 0 : i32
    %2 = arith.cmpi ne, %1, %c0_i32_0 : i32
    scf.if %2 {
      %cst_14 = arith.constant 0.000000e+00 : f32
      %28 = vector.broadcast %cst_14 : f32 to vector<8x128xf32>
      %c0_15 = arith.constant 0 : index
      %c0_16 = arith.constant 0 : index
      %29 = vector.load %arg7[%c0_15, %c0_16] : memref<8x128xf32, #tpu.memory_space<vmem>>, vector<8x128xf32>
      tpu.vector_store %arg7[%c0_15, %c0_16], %28 {strides = array<i32>} : memref<8x128xf32, #tpu.memory_space<vmem>>, vector<8x128xf32>,
    } else {
    }
    %c0 = arith.constant 0 : index
    %c0_1 = arith.constant 0 : index
    %3 = vector.load %arg3[%c0, %c0_1] : memref<8x128xf32, #tpu.memory_space<vmem>>, vector<8x128xf32>
    %c0_2 = arith.constant 0 : index
    %c0_3 = arith.constant 0 : index
    %4 = vector.load %arg4[%c0_2, %c0_3] : memref<128x128xf32, #tpu.memory_space<vmem>>, vector<128x128xf32>
    %c128_i32 = arith.constant 128 : i32
    %5 = arith.muli %arg2, %c128_i32 : i32
    %6 = tpu.iota {dimensions = array<i32: 1>} : vector<8x128xi32>
    %7 = vector.broadcast %5 : i32 to vector<8x128xi32>
    %8 = arith.addi %7, %6 : vector<8x128xi32>
    %c32_i32 = arith.constant 32 : i32
    %9 = vector.broadcast %c32_i32 : i32 to vector<8x128xi32>
    %10 = arith.cmpi slt, %8, %9 : vector<8x128xi32>
    %cst = arith.constant 0.000000e+00 : f32
    %11 = vector.broadcast %cst : f32 to vector<8x128xf32>
    %12 = arith.select %10, %3, %11 : vector<8x128xi1>, vector<8x128xf32>
    %c128_i32_4 = arith.constant 128 : i32
    %13 = arith.muli %arg2, %c128_i32_4 : i32
    %14 = tpu.iota {dimensions = array<i32: 0>} : vector<128x128xi32>
    %15 = vector.broadcast %13 : i32 to vector<128x128xi32>
    %16 = arith.addi %15, %14 : vector<128x128xi32>
    %c32_i32_5 = arith.constant 32 : i32
    %17 = vector.broadcast %c32_i32_5 : i32 to vector<128x128xi32>
    %18 = arith.cmpi slt, %16, %17 : vector<128x128xi32>
    %cst_6 = arith.constant 0.000000e+00 : f32
    %19 = vector.broadcast %cst_6 : f32 to vector<128x128xf32>
    %20 = arith.select %18, %4, %19 : vector<128x128xi1>, vector<128x128xf32>
    %c0_7 = arith.constant 0 : index
    %c0_8 = arith.constant 0 : index
    %21 = vector.load %arg7[%c0_7, %c0_8] : memref<8x128xf32, #tpu.memory_space<vmem>>, vector<8x128xf32>
    %cst_9 = arith.constant dense<0.000000e+00> : vector<8x128xf32>
    %22 = tpu.matmul %12, %20, %cst_9 {dimension_numbers = #tpu.dot_dimension_numbers<[1], [0], [0], [1], [0, 0, 1, 1], [], []>} : vector<8x128xf32>, vector<128x128xf32>, vector<8x128xf32> -> vector<8x128xf32>
    %23 = arith.addf %21, %22 : vector<8x128xf32>
    %c0_10 = arith.constant 0 : index
    %c0_11 = arith.constant 0 : index
    %24 = vector.load %arg7[%c0_10, %c0_11] : memref<8x128xf32, #tpu.memory_space<vmem>>, vector<8x128xf32>
    tpu.vector_store %arg7[%c0_10, %c0_11], %23 {strides = array<i32>} : memref<8x128xf32, #tpu.memory_space<vmem>>, vector<8x128xf32>,
    %c0_i32_12 = arith.constant 0 : i32
    %25 = arith.cmpi eq, %arg2, %c0_i32_12 : i32
    %26 = arith.extui %25 : i1 to i32
    %c0_i32_13 = arith.constant 0 : i32
    %27 = arith.cmpi ne, %26, %c0_i32_13 : i32
    scf.if %27 {
      %c0_14 = arith.constant 0 : index
      %c0_15 = arith.constant 0 : index
      %28 = vector.load %arg7[%c0_14, %c0_15] : memref<8x128xf32, #tpu.memory_space<vmem>>, vector<8x128xf32>
      %c0_16 = arith.constant 0 : index
      %c0_17 = arith.constant 0 : index
      %29 = vector.load %arg5[%c0_16, %c0_17] : memref<1x128xf32, #tpu.memory_space<vmem>>, vector<1x128xf32>
      %30 = vector.broadcast %29 : vector<1x128xf32> to vector<8x128xf32>
      %31 = arith.addf %28, %30 : vector<8x128xf32>
      %cst_18 = arith.constant 0.000000e+00 : f32
      %32 = vector.broadcast %cst_18 : f32 to vector<8x128xf32>
      %33 = arith.maximumf %31, %32 : vector<8x128xf32>
      %c0_19 = arith.constant 0 : index
      %c0_20 = arith.constant 0 : index
      %34 = vector.load %arg6[%c0_19, %c0_20] : memref<8x128xf32, #tpu.memory_space<vmem>>, vector<8x128xf32>
      tpu.vector_store %arg6[%c0_19, %c0_20], %33 {strides = array<i32>} : memref<8x128xf32, #tpu.memory_space<vmem>>, vector<8x128xf32>,
    } else {
    }
    return
  }
  func.func @transform_0(%arg0: i32, %arg1: i32, %arg2: i32) -> (i32, i32) {
    %c0_i32 = arith.constant 0 : i32
    return %arg0, %arg2 : i32, i32
  }
  func.func @transform_1(%arg0: i32, %arg1: i32, %arg2: i32) -> (i32, i32) {
    %c0_i32 = arith.constant 0 : i32
    return %arg2, %arg1 : i32, i32
  }
  func.func @transform_2(%arg0: i32, %arg1: i32, %arg2: i32) -> (i32, i32) {
    %c0_i32 = arith.constant 0 : i32
    %c0_i32_0 = arith.constant 0 : i32
    return %c0_i32, %arg1 : i32, i32
  }
  func.func @transform_3(%arg0: i32, %arg1: i32, %arg2: i32) -> (i32, i32) {
    %c0_i32 = arith.constant 0 : i32
    return %arg0, %arg1 : i32, i32
  }
}

</mosaic_0001>

<bundles_post_ra>
// kernel: tpu_custom_call.1
= control target key start
LH: loop header
LB: loop body
LE: loop exit
PB: predicated region body
PF: predicated region fallthrough
CT: control target
= control target key end

     0   :  { %8 = vsyncpa [#allocation4], 0  ;;  %s313_s0 = inlined_call_operand.hbm [shape: f32[8,32], index: 0, kind: input, shape index: {}]   ;;  %s314_s1 = inlined_call_operand.hbm [shape: f32[32,32], index: 1, kind: input, shape index: {}]   ;;  %s315_s2 = inlined_call_operand.vmem [shape: f32[1,32], index: 2, kind: input, shape index: {}]   ;;  %s316_s3 = inlined_call_operand.hbm [shape: f32[8,32], index: 3, kind: output, shape index: {}]  }
   0x1   :  { %9 = vsyncpa [#allocation7], 0 }
   0x2   :  { %10 = vsyncpa [#allocation5], 0  ;;  %s16_s14 = sshll.u32 %s313_s0, 4  ;;  %s276_s15 = smov [#allocation3]   ;;  %s17_s14 = int_to_ptr.hbm [resolvable:$true] %s16_s14 }
   0x3   :  { %s18_s16 = sshll.u32 %s276_s15, 4  ;;  %s19_s16 = int_to_ptr.vmem [resolvable:$true] %s18_s16 }
   0x4   :  { %21 = dma.hbm_to_vmem [thread:$0]  %s17_s14, 128, %s19_s16, [#allocation4]  }
   0x5   :  { %25 = vsyncadd [#allocation7], 1536  ;;  %s26_s19 = sshll.u32 %s314_s1, 4  ;;  %s277_s20 = smov [#allocation6]   ;;  %s27_s19 = int_to_ptr.hbm [resolvable:$true] %s26_s19 }
   0x6   :  { %s28_s21 = sshll.u32 %s277_s20, 4  ;;  %s278_s22 = smov 128   ;;  %s29_s21 = int_to_ptr.vmem [resolvable:$true] %s28_s21 }
   0x7   :  { %s279_s23 = smov 8  }
   0x8   :  { %34 = dma.hbm_to_vmem [thread:$0]  %s27_s19, 512, %s29_s21, [#allocation7], %s278_s22, %s278_s22, %s279_s23  }
   0x9   :  { %270 = dma.done.wait [#allocation4], 128  }
   0xa   :  { %271 = vsyncadd [#allocation4], 4294967168 }
   0xb   :  { %272 = dma.done.wait [#allocation7], 2048  }
   0xc   :  { %273 = vsyncadd [#allocation7], 4294965248  ;;  %v68_v0 = vlaneseq  ;;  %v54_v1 = vld [vmem:[#allocation6 + $0x18] sm:$0xff]  ;;  %v53_v2 = vld [vmem:[#allocation6 + $0x10] sm:$0xff]  ;;  %s280_s24 = smov [#allocation8]   ;;  %s180_s28 = sshll.u32 %s316_s3, 4  ;;  %s181_s28 = int_to_ptr.hbm [resolvable:$true] %s180_s28 }
   0xd   :  { %152 = vmatpush.msra.mxu0 %v54_v1  ;;  %v52_v4 = vld [vmem:[#allocation6 + $0x8] sm:$0xff]  ;;  %v51_v5 = vld [vmem:[#allocation6] sm:$0xff]  ;;  %v50_v6 = vld [vmem:[#allocation3] sm:$0xff]  ;;  %s178_s25 = sshll.u32 %s280_s24, 4  ;;  %s179_s25 = int_to_ptr.vmem [resolvable:$true] %s178_s25 }
   0xe   :  { %v69_v3 = vand.u32 127, %v68_v0  ;;  %v197_v7 = vld [vmem:[%s315_s2] ss:$0 sm:$0xff] }
   0xf   :  { %153 = vmatpush.msra.mxu0 %v53_v2 }
  0x10   :  { %vm72_vm0 = vcmp.lt.s32.totalorder %v69_v3, 32 }
  0x11   :  { %154 = vmatpush.msra.mxu0 %v52_v4 }
  0x13   :  { %155 = vmatpush.msra.mxu0 %v51_v5 }
  0x14   :  { %191 = vmatmul.msk.f32.vlgmr.msra.gmra.mxu0 %vm72_vm0, %v50_v6 }
  0x91   :  { %v157_v8 = vpop.f32.mrf.mxu0 }
  0x92   :  { %v170_v9 = vadd.f32 %v197_v7, %v157_v8 }
  0x94   :  { %v171_v10 = vmax.f32 %v170_v9, 0.0 }
  0x96   :  { %172 = vst [vmem:[#allocation8] sm:$0xff] %v171_v10 }
  0x97   :  { %183 = dma.vmem_to_hbm [thread:$0]  %s179_s25, 128, %s181_s28, [#allocation5]  }
  0x98   :  { %274 = dma.done.wait [#allocation5], 128  }
  0x99   :  { %275 = vsyncadd [#allocation5], 4294967168 }
  0x9a   :  { %188 = vsyncpa [#allocation4], 1 }
  0x9b   :  { %189 = vsyncpa [#allocation7], 1 }
  0x9c   :  { %190 = vsyncpa [#allocation5], 1 }

</bundles_post_ra>
